<compile_context>
chip_gen: v5e
topology: v5e:2x2
jax: 0.10.0
libtpu: 0.0.40
codegen_flags: <defaults>
</compile_context>

<pallas_src>
import functools

import jax
import jax.numpy as jnp
from jax.experimental import pallas as pl
from jax.experimental.pallas import tpu as pltpu


def _moe_fused_kernel(x_ref, w_ref, b_ref, o_ref, *, num_experts, num_classes,
                      router_off):
    # x_ref : [B, D]     bf16 flattened input
    # w_ref : [D, Npad]  bf16 fused weights: expert e at lanes [e*C, (e+1)*C),
    #                    router at lanes [router_off, router_off+E)
    # b_ref : [1, Npad]  f32 fused biases (same layout)
    # o_ref : [B, C]     f32 output
    E, C = num_experts, num_classes
    x = x_ref[...]
    B = x.shape[0]

    # ---- single fused MXU pass: router + all experts, f32 accumulation ----
    y = jnp.dot(x, w_ref[...], preferred_element_type=jnp.float32)   # [B, Npad]
    y = y + b_ref[...]

    # ---- router: logits -> hard routing (straight-through forward value) ----
    logits = y[:, router_off:router_off + E]                          # [B, E] f32
    m = jnp.max(logits, axis=-1, keepdims=True)

    # argmax over logits with first-index tie-break (== torch.max(dim=1)[1]);
    # invariant under softmax, so immune to the approximate reciprocal below.
    col = jax.lax.broadcasted_iota(jnp.int32, (B, E), 1)
    idx = jnp.min(jnp.where(logits >= m, col, E), axis=-1, keepdims=True)
    one_hot = (col == idx).astype(jnp.float32)                        # [B, E]

    # softmax kept in f32; denominator reciprocal goes to the EUP slot.
    ex = jnp.exp(logits - m)
    p = ex * pl.reciprocal(jnp.sum(ex, axis=-1, keepdims=True), approx=True)

    # straight-through variable: forward value == one_hot up to 1 ulp,
    # same op order as the PyTorch module.
    a = (one_hot - p) + p                                             # [B, E]

    # ---- routing-weighted sum of the expert heads (static lane slices) ----
    acc = a[:, 0:1] * y[:, 0:C]
    for e in range(1, E):  # E small & static -> fully unrolled VPU ops
        acc = acc + a[:, e:e + 1] * y[:, e * C:(e + 1) * C]
    o_ref[...] = acc


def moe_ensemble_forward(x_nchw, wr, br, we, be):
    """x_nchw: [B, Cin, H, W]; wr: [D, E]; br: [1, E]; we: [E, D, C]; be: [E, 1, C]."""
    B = x_nchw.shape[0]
    E, D, C = we.shape
    assert wr.shape == (D, E)

    # Fused, lane-padded weight layout [D, Npad]: experts packed at lanes
    # [0, E*C), router at a sublane/64-aligned offset, padded to a full
    # 128-lane MXU tile so the single dot is one unmasked column tile.
    router_off = -(-max(E * C, 64) // 8) * 8
    npad = -(-(router_off + E) // 128) * 128

    w_fused = jnp.zeros((D, npad), jnp.float32)
    w_fused = w_fused.at[:, :E * C].set(jnp.transpose(we, (1, 0, 2)).reshape(D, E * C))
    w_fused = w_fused.at[:, router_off:router_off + E].set(wr)

    b_fused = jnp.zeros((1, npad), jnp.float32)
    b_fused = b_fused.at[:, :E * C].set(be.reshape(1, E * C))
    b_fused = b_fused.at[:, router_off:router_off + E].set(br)

    # bf16 matmul operands (MXU-native on v5e/v6e/v7x), f32 accumulation.
    x2d = x_nchw.reshape(B, D).astype(jnp.bfloat16)
    w_bf16 = w_fused.astype(jnp.bfloat16)

    kernel = functools.partial(_moe_fused_kernel, num_experts=E,
                               num_classes=C, router_off=router_off)

    cost = pl.CostEstimate(
        flops=2 * B * D * npad,
        transcendentals=B * E,
        bytes_accessed=(x2d.size * 2 + w_bf16.size * 2
                        + b_fused.size * 4 + B * C * 4),
    )

    # B=2: grid-less single invocation (a B-grid would only add per-step
    # overhead here; add a ("parallel",) grid over B tiles if B grows).
    return pl.pallas_call(
        kernel,
        out_shape=jax.ShapeDtypeStruct((B, C), jnp.float32),
        in_specs=[pl.BlockSpec(memory_space=pltpu.MemorySpace.VMEM)] * 3,
        out_specs=pl.BlockSpec(memory_space=pltpu.MemorySpace.VMEM),
        compiler_params=pltpu.CompilerParams(vmem_limit_bytes=16 * 1024 * 1024),
        cost_estimate=cost,
    )(x2d, w_bf16, b_fused)


def _kaiming_normal(key, shape, fan_in):
    return jax.random.normal(key, shape, dtype=jnp.float32) * jnp.sqrt(2.0 / fan_in)


if __name__ == "__main__":
    # small shapes consistent with the module's forward
    B, Cin, H, W = 2, 4, 16, 16
    num_experts = 5
    num_classes = 10
    D = Cin * H * W

    key = jax.random.PRNGKey(0)
    kx, kwr, kwe = jax.random.split(key, 3)

    x = jax.random.normal(kx, (B, Cin, H, W), dtype=jnp.float32)

    # deterministic, kaiming-normal-style parameter init
    wr = _kaiming_normal(kwr, (D, num_experts), fan_in=D)               # router weight
    br = jnp.zeros((1, num_experts), dtype=jnp.float32)                 # router bias
    we = _kaiming_normal(kwe, (num_experts, D, num_classes), fan_in=D)  # expert weights
    be = jnp.zeros((num_experts, 1, num_classes), dtype=jnp.float32)    # expert biases

    out = moe_ensemble_forward(x, wr, br, we, be)
    out = jax.block_until_ready(out)

    # reference in plain JAX, using the same bf16-quantized matmul operands
    # with f32 accumulation (apples-to-apples with the kernel's MXU math).
    xq = x.reshape(B, D).astype(jnp.bfloat16).astype(jnp.float32)
    wrq = wr.astype(jnp.bfloat16).astype(jnp.float32)
    weq = we.astype(jnp.bfloat16).astype(jnp.float32)
    logits = xq @ wrq + br
    p = jax.nn.softmax(logits, axis=-1)
    one_hot = jax.nn.one_hot(jnp.argmax(p, axis=-1), num_experts, dtype=p.dtype)
    a = (one_hot - p) + p
    b_stack = jnp.stack([xq @ weq[e] + be[e] for e in range(num_experts)], axis=1)
    ref = jnp.sum(a[:, :, None] * b_stack, axis=1)

    assert out.shape == (B, num_classes)
    assert jnp.allclose(out, ref, atol=2e-4, rtol=2e-4), (
        f"max abs err {jnp.max(jnp.abs(out - ref))}")

    print("KERNEL_OK")
</pallas_src>

<mosaic_0001>
module attributes {stable_mosaic.version = 11 : i64} {
  func.func @_moe_fused_kernel(%arg0: memref<2x1024xbf16, #tpu.memory_space<vmem>>, %arg1: memref<1024x128xbf16, #tpu.memory_space<vmem>>, %arg2: memref<1x128xf32, #tpu.memory_space<vmem>>, %arg3: memref<2x10xf32, #tpu.memory_space<vmem>>) attributes {dimension_semantics = [], scalar_prefetch = 0 : i64, scratch_operands = 0 : i64, tpu.core_type = #tpu.core_type<tc>} {
    %c0 = arith.constant 0 : index
    %c0_0 = arith.constant 0 : index
    %0 = vector.load %arg0[%c0, %c0_0] : memref<2x1024xbf16, #tpu.memory_space<vmem>>, vector<2x1024xbf16>
    %c0_1 = arith.constant 0 : index
    %c0_2 = arith.constant 0 : index
    %1 = vector.load %arg1[%c0_1, %c0_2] : memref<1024x128xbf16, #tpu.memory_space<vmem>>, vector<1024x128xbf16>
    %cst = arith.constant dense<0.000000e+00> : vector<2x128xf32>
    %2 = tpu.matmul %0, %1, %cst {dimension_numbers = #tpu.dot_dimension_numbers<[1], [0], [0], [1], [0, 0, 1, 1], [], []>} : vector<2x1024xbf16>, vector<1024x128xbf16>, vector<2x128xf32> -> vector<2x128xf32>
    %c0_3 = arith.constant 0 : index
    %c0_4 = arith.constant 0 : index
    %3 = vector.load %arg2[%c0_3, %c0_4] : memref<1x128xf32, #tpu.memory_space<vmem>>, vector<1x128xf32>
    %4 = vector.broadcast %3 : vector<1x128xf32> to vector<2x128xf32>
    %5 = arith.addf %2, %4 : vector<2x128xf32>
    %6 = vector.extract_strided_slice %5 {offsets = [0, 64], sizes = [2, 5], strides = [1, 1]} : vector<2x128xf32> to vector<2x5xf32>
    %cst_5 = arith.constant dense<0xFF800000> : vector<2xf32>
    %7 = vector.multi_reduction <maximumf>, %6, %cst_5 [1] : vector<2x5xf32> to vector<2xf32>
    %8 = vector.shape_cast %7 : vector<2xf32> to vector<2x1xf32>
    %9 = tpu.iota {dimensions = array<i32: 1>} : vector<2x5xi32>
    %10 = vector.broadcast %8 : vector<2x1xf32> to vector<2x5xf32>
    %11 = arith.cmpf oge, %6, %10 : vector<2x5xf32>
    %c5_i32 = arith.constant 5 : i32
    %12 = vector.broadcast %c5_i32 : i32 to vector<2x5xi32>
    %13 = arith.select %11, %9, %12 : vector<2x5xi1>, vector<2x5xi32>
    %cst_6 = arith.constant dense<2147483647> : vector<2xi32>
    %14 = vector.multi_reduction <minsi>, %13, %cst_6 [1] : vector<2x5xi32> to vector<2xi32>
    %15 = vector.shape_cast %14 : vector<2xi32> to vector<2x1xi32>
    %16 = vector.broadcast %15 : vector<2x1xi32> to vector<2x5xi32>
    %17 = arith.cmpi eq, %9, %16 : vector<2x5xi32>
    %18 = arith.extui %17 : vector<2x5xi1> to vector<2x5xi32>
    %19 = arith.sitofp %18 : vector<2x5xi32> to vector<2x5xf32>
    %20 = vector.broadcast %8 : vector<2x1xf32> to vector<2x5xf32>
    %21 = arith.subf %6, %20 : vector<2x5xf32>
    %22 = math.exp %21 : vector<2x5xf32>
    %cst_7 = arith.constant dense<0.000000e+00> : vector<2xf32>
    %23 = vector.multi_reduction <add>, %22, %cst_7 [1] : vector<2x5xf32> to vector<2xf32>
    %24 = vector.shape_cast %23 : vector<2xf32> to vector<2x1xf32>
    %25 = tpu.reciprocal %24 {approx = true} : vector<2x1xf32> -> vector<2x1xf32>
    %26 = vector.broadcast %25 : vector<2x1xf32> to vector<2x5xf32>
    %27 = arith.mulf %22, %26 : vector<2x5xf32>
    %28 = arith.subf %19, %27 : vector<2x5xf32>
    %29 = arith.addf %28, %27 : vector<2x5xf32>
    %30 = vector.extract_strided_slice %29 {offsets = [0, 0], sizes = [2, 1], strides = [1, 1]} : vector<2x5xf32> to vector<2x1xf32>
    %31 = vector.extract_strided_slice %5 {offsets = [0, 0], sizes = [2, 10], strides = [1, 1]} : vector<2x128xf32> to vector<2x10xf32>
    %32 = vector.broadcast %30 : vector<2x1xf32> to vector<2x10xf32>
    %33 = arith.mulf %32, %31 : vector<2x10xf32>
    %34 = vector.extract_strided_slice %29 {offsets = [0, 1], sizes = [2, 1], strides = [1, 1]} : vector<2x5xf32> to vector<2x1xf32>
    %35 = vector.extract_strided_slice %5 {offsets = [0, 10], sizes = [2, 10], strides = [1, 1]} : vector<2x128xf32> to vector<2x10xf32>
    %36 = vector.broadcast %34 : vector<2x1xf32> to vector<2x10xf32>
    %37 = arith.mulf %36, %35 : vector<2x10xf32>
    %38 = arith.addf %33, %37 : vector<2x10xf32>
    %39 = vector.extract_strided_slice %29 {offsets = [0, 2], sizes = [2, 1], strides = [1, 1]} : vector<2x5xf32> to vector<2x1xf32>
    %40 = vector.extract_strided_slice %5 {offsets = [0, 20], sizes = [2, 10], strides = [1, 1]} : vector<2x128xf32> to vector<2x10xf32>
    %41 = vector.broadcast %39 : vector<2x1xf32> to vector<2x10xf32>
    %42 = arith.mulf %41, %40 : vector<2x10xf32>
    %43 = arith.addf %38, %42 : vector<2x10xf32>
    %44 = vector.extract_strided_slice %29 {offsets = [0, 3], sizes = [2, 1], strides = [1, 1]} : vector<2x5xf32> to vector<2x1xf32>
    %45 = vector.extract_strided_slice %5 {offsets = [0, 30], sizes = [2, 10], strides = [1, 1]} : vector<2x128xf32> to vector<2x10xf32>
    %46 = vector.broadcast %44 : vector<2x1xf32> to vector<2x10xf32>
    %47 = arith.mulf %46, %45 : vector<2x10xf32>
    %48 = arith.addf %43, %47 : vector<2x10xf32>
    %49 = vector.extract_strided_slice %29 {offsets = [0, 4], sizes = [2, 1], strides = [1, 1]} : vector<2x5xf32> to vector<2x1xf32>
    %50 = vector.extract_strided_slice %5 {offsets = [0, 40], sizes = [2, 10], strides = [1, 1]} : vector<2x128xf32> to vector<2x10xf32>
    %51 = vector.broadcast %49 : vector<2x1xf32> to vector<2x10xf32>
    %52 = arith.mulf %51, %50 : vector<2x10xf32>
    %53 = arith.addf %48, %52 : vector<2x10xf32>
    %c0_8 = arith.constant 0 : index
    %c0_9 = arith.constant 0 : index
    %54 = vector.load %arg3[%c0_8, %c0_9] : memref<2x10xf32, #tpu.memory_space<vmem>>, vector<2x10xf32>
    tpu.vector_store %arg3[%c0_8, %c0_9], %53 {strides = array<i32>} : memref<2x10xf32, #tpu.memory_space<vmem>>, vector<2x10xf32>,
    return
  }
}

</mosaic_0001>

<bundles_post_ra>
// kernel: tpu_custom_call.1
= control target key start
LH: loop header
LB: loop body
LE: loop exit
PB: predicated region body
PF: predicated region fallthrough
CT: control target
= control target key end

     0   :  { %8 = vsyncpa [#allocation3], 0  ;;  %s1286_s0 = inlined_call_operand.hbm [shape: bf16[2,1024], index: 0, kind: input, shape index: {}]   ;;  %s1287_s1 = inlined_call_operand.hbm [shape: bf16[1024,128], index: 1, kind: input, shape index: {}]   ;;  %s1288_s2 = inlined_call_operand.vmem [shape: f32[1,128], index: 2, kind: input, shape index: {}]   ;;  %s1289_s3 = inlined_call_operand.hbm [shape: f32[2,10], index: 3, kind: output, shape index: {}]  }
   0x1   :  { %9 = vsyncpa [#allocation6], 0 }
   0x2   :  { %10 = vsyncpa [#allocation4], 0  ;;  %s16_s14 = sshll.u32 %s1286_s0, 4  ;;  %s1222_s15 = smov [#allocation2]   ;;  %s17_s14 = int_to_ptr.hbm [resolvable:$true] %s16_s14 }
   0x3   :  { %s18_s16 = sshll.u32 %s1222_s15, 4  ;;  %s26_s19 = sshll.u32 %s1287_s1, 4  ;;  %s19_s16 = int_to_ptr.vmem [resolvable:$true] %s18_s16  ;;  %s27_s19 = int_to_ptr.hbm [resolvable:$true] %s26_s19 }
   0x4   :  { %21 = dma.hbm_to_vmem [thread:$0]  %s17_s14, 128, %s19_s16, [#allocation3]  }
   0x5   :  { %s1223_s20 = smov [#allocation5]   ;;  %s1224_s22 = smov 64  }
   0x6   :  { %s28_s21 = sshll.u32 %s1223_s20, 4  ;;  %s1225_s23 = smov 4   ;;  %s29_s21 = int_to_ptr.vmem [resolvable:$true] %s28_s21 }
   0x7   :  { %34 = dma.hbm_to_vmem [thread:$0]  %s27_s19, 8192, %s29_s21, [#allocation6], %s1224_s22, %s1224_s22, %s1225_s23  }
   0x8   :  { %1216 = dma.done.wait [#allocation3], 128  }
   0x9   :  { %1217 = vsyncadd [#allocation3], 4294967168 }
   0xa   :  { %1218 = dma.done.wait [#allocation6], 8192  }
   0xb   :  { %1219 = vsyncadd [#allocation6], 4294959104  ;;  %v1061_v0 = vld [vmem:[#allocation5 + $0x38] sm:$0xff]  ;;  %v1060_v4 = vld [vmem:[#allocation5 + $0x30] sm:$0xff]  ;;  %vm684_vm0 = vcmask 558592   ;;  %vm719_vm2 = vcmask 33792  }
   0xc   :  { %v1069_v1 = vld [vmem:[#allocation5 + $0x78] sm:$0xff]  ;;  %580 = vmatpush.bf16.msra.mxu0 %v1061_v0  ;;  %v1068_v5 = vld [vmem:[#allocation5 + $0x70] sm:$0xff]  ;;  %v1059_v8 = vld [vmem:[#allocation5 + $0x28] sm:$0xff]  ;;  %s1233_s24 = smov 88   ;;  %s1234_s25 = smov 118   ;;  %vm777_vm5 = vcmask 74752  }
   0xd   :  { %v1077_v2 = vld [vmem:[#allocation5 + $0xb8] sm:$0xff]  ;;  %593 = vmatpush.bf16.msra.mxu1 %v1069_v1  ;;  %v1076_v6 = vld [vmem:[#allocation5 + $0xb0] sm:$0xff]  ;;  %v1067_v9 = vld [vmem:[#allocation5 + $0x68] sm:$0xff]  ;;  %s1235_s26 = smov 98   ;;  %s1236_s27 = smov [#allocation7]  }
   0xe   :  { %v1085_v3 = vld [vmem:[#allocation5 + $0xf8] sm:$0xff]  ;;  %606 = vmatpush.bf16.msra.mxu2 %v1077_v2  ;;  %v1084_v7 = vld [vmem:[#allocation5 + $0xf0] sm:$0xff]  ;;  %v1075_v10 = vld [vmem:[#allocation5 + $0xa8] sm:$0xff]  ;;  %s784_s28 = sshll.u32 %s1236_s27, 4  ;;  %s786_s4 = sshll.u32 %s1289_s3, 4  ;;  %s785_s28 = int_to_ptr.vmem [resolvable:$true] %s784_s28  ;;  %s787_s4 = int_to_ptr.hbm [resolvable:$true] %s786_s4 }
   0xf   :  { %619 = vmatpush.bf16.msra.mxu3 %v1085_v3  ;;  %v1083_v11 = vld [vmem:[#allocation5 + $0xe8] sm:$0xff]  ;;  %v1058_v12 = vld [vmem:[#allocation5 + $0x20] sm:$0xff]  ;;  %v45_v16 = vld [vmem:[#allocation2] sm:$0xff] }
  0x10   :  { %581 = vmatpush.bf16.msra.mxu0 %v1060_v4  ;;  %v1066_v13 = vld [vmem:[#allocation5 + $0x60] sm:$0xff]  ;;  %v1057_v17 = vld [vmem:[#allocation5 + $0x18] sm:$0xff]  ;;  %179 = vst [vmem:[#allocation1] ss:$9 sm:$0xff] %v45_v16  ;;  %v1056_v21 = vld [vmem:[#allocation5 + $0x10] sm:$0xff] }
  0x11   :  { %594 = vmatpush.bf16.msra.mxu1 %v1068_v5  ;;  %v1074_v14 = vld [vmem:[#allocation5 + $0xa0] sm:$0xff]  ;;  %v1065_v18 = vld [vmem:[#allocation5 + $0x58] sm:$0xff]  ;;  %v1064_v22 = vld [vmem:[#allocation5 + $0x50] sm:$0xff] }
  0x12   :  { %607 = vmatpush.bf16.msra.mxu2 %v1076_v6  ;;  %v1082_v15 = vld [vmem:[#allocation5 + $0xe0] sm:$0xff]  ;;  %v1073_v19 = vld [vmem:[#allocation5 + $0x98] sm:$0xff]  ;;  %v1072_v23 = vld [vmem:[#allocation5 + $0x90] sm:$0xff] }
  0x13   :  { %620 = vmatpush.bf16.msra.mxu3 %v1084_v7  ;;  %v1081_v20 = vld [vmem:[#allocation5 + $0xd8] sm:$0xff]  ;;  %v1080_v24 = vld [vmem:[#allocation5 + $0xd0] sm:$0xff]  ;;  %v1055_v25 = vld [vmem:[#allocation5 + $0x8] sm:$0xff] }
  0x14   :  { %582 = vmatpush.bf16.msra.mxu0 %v1059_v8  ;;  %v1063_v26 = vld [vmem:[#allocation5 + $0x48] sm:$0xff]  ;;  %v1054_v29 = vld [vmem:[#allocation5] sm:$0xff]  ;;  %v1093_v33 = vld [vmem:[#allocation5 + $0x138] sm:$0xff] }
  0x15   :  { %595 = vmatpush.bf16.msra.mxu1 %v1067_v9  ;;  %v1071_v27 = vld [vmem:[#allocation5 + $0x88] sm:$0xff]  ;;  %v1062_v30 = vld [vmem:[#allocation5 + $0x40] sm:$0xff]  ;;  %v1101_v34 = vld [vmem:[#allocation5 + $0x178] sm:$0xff] }
  0x16   :  { %608 = vmatpush.bf16.msra.mxu2 %v1075_v10  ;;  %v1079_v28 = vld [vmem:[#allocation5 + $0xc8] sm:$0xff]  ;;  %v1070_v31 = vld [vmem:[#allocation5 + $0x80] sm:$0xff]  ;;  %v1109_v35 = vld [vmem:[#allocation5 + $0x1b8] sm:$0xff] }
  0x17   :  { %621 = vmatpush.bf16.msra.mxu3 %v1083_v11  ;;  %v1078_v32 = vld [vmem:[#allocation5 + $0xc0] sm:$0xff]  ;;  %v1117_v36 = vld [vmem:[#allocation5 + $0x1f8] sm:$0xff]  ;;  %v1092_v37 = vld [vmem:[#allocation5 + $0x130] sm:$0xff] }
  0x18   :  { %583 = vmatpush.bf16.msra.mxu0 %v1058_v12  ;;  %v182_v38 = vld [vmem:[#allocation1 + $0x12] sm:$0xff]  ;;  %v180_v39 = vld [vmem:[#allocation1] sm:$0xff]  ;;  %v181_v42 = vld [vmem:[#allocation1 + $0x9] sm:$0xff] }
  0x19   :  { %596 = vmatpush.bf16.msra.mxu1 %v1066_v13  ;;  %v1100_v40 = vld [vmem:[#allocation5 + $0x170] sm:$0xff]  ;;  %v1091_v45 = vld [vmem:[#allocation5 + $0x128] sm:$0xff]  ;;  %v1090_v49 = vld [vmem:[#allocation5 + $0x120] sm:$0xff] }
  0x1a   :  { %609 = vmatpush.bf16.msra.mxu2 %v1074_v14  ;;  %v183_v41 = vld [vmem:[#allocation1 + $0x1b] sm:$0xff]  ;;  %v1098_v50 = vld [vmem:[#allocation5 + $0x160] sm:$0xff]  ;;  %v1089_v53 = vld [vmem:[#allocation5 + $0x118] sm:$0xff] }
  0x1b   :  { %622 = vmatpush.bf16.msra.mxu3 %v1082_v15  ;;  %v1108_v43 = vld [vmem:[#allocation5 + $0x1b0] sm:$0xff]  ;;  %v1099_v46 = vld [vmem:[#allocation5 + $0x168] sm:$0xff]  ;;  %v1106_v51 = vld [vmem:[#allocation5 + $0x1a0] sm:$0xff] }
  0x1c   :  { %584 = vmatpush.bf16.msra.mxu0 %v1057_v17  ;;  %v1116_v44 = vld [vmem:[#allocation5 + $0x1f0] sm:$0xff]  ;;  %v1107_v47 = vld [vmem:[#allocation5 + $0x1a8] sm:$0xff]  ;;  %v1114_v52 = vld [vmem:[#allocation5 + $0x1e0] sm:$0xff] }
  0x1d   :  { %597 = vmatpush.bf16.msra.mxu1 %v1065_v18  ;;  %v1115_v48 = vld [vmem:[#allocation5 + $0x1e8] sm:$0xff]  ;;  %v1097_v54 = vld [vmem:[#allocation5 + $0x158] sm:$0xff]  ;;  %v1088_v57 = vld [vmem:[#allocation5 + $0x110] sm:$0xff] }
  0x1e   :  { %610 = vmatpush.bf16.msra.mxu2 %v1073_v19  ;;  %v1105_v55 = vld [vmem:[#allocation5 + $0x198] sm:$0xff]  ;;  %v1096_v58 = vld [vmem:[#allocation5 + $0x150] sm:$0xff]  ;;  %v1087_v61 = vld [vmem:[#allocation5 + $0x108] sm:$0xff] }
  0x1f   :  { %623 = vmatpush.bf16.msra.mxu3 %v1081_v20  ;;  %v1113_v56 = vld [vmem:[#allocation5 + $0x1d8] sm:$0xff]  ;;  %v1104_v59 = vld [vmem:[#allocation5 + $0x190] sm:$0xff]  ;;  %v1095_v62 = vld [vmem:[#allocation5 + $0x148] sm:$0xff] }
  0x20   :  { %585 = vmatpush.bf16.msra.mxu0 %v1056_v21  ;;  %v1112_v60 = vld [vmem:[#allocation5 + $0x1d0] sm:$0xff]  ;;  %v1103_v63 = vld [vmem:[#allocation5 + $0x188] sm:$0xff]  ;;  %v1086_v1 = vld [vmem:[#allocation5 + $0x100] sm:$0xff] }
  0x21   :  { %598 = vmatpush.bf16.msra.mxu1 %v1064_v22  ;;  %v1111_v0 = vld [vmem:[#allocation5 + $0x1c8] sm:$0xff]  ;;  %v1094_v2 = vld [vmem:[#allocation5 + $0x140] sm:$0xff]  ;;  %v184_v5 = vld [vmem:[#allocation1 + $0x24] sm:$0xff] }
  0x22   :  { %611 = vmatpush.bf16.msra.mxu2 %v1072_v23  ;;  %v1102_v3 = vld [vmem:[#allocation5 + $0x180] sm:$0xff]  ;;  %v187_v8 = vld [vmem:[#allocation1 + $0x3f] sm:$0xff] }
  0x23   :  { %624 = vmatpush.bf16.msra.mxu3 %v1080_v24  ;;  %v1110_v4 = vld [vmem:[#allocation5 + $0x1c0] sm:$0xff]  ;;  %v1139_v15 = vld [vmem:[%s1288_s2] ss:$0 sm:$0xff]  ;;  %s1232_s2 = smov 108  }
  0x24   :  { %586 = vmatpush.bf16.msra.mxu0 %v1055_v25  ;;  %v185_v6 = vld [vmem:[#allocation1 + $0x2d] sm:$0xff]  ;;  %v186_v7 = vld [vmem:[#allocation1 + $0x36] sm:$0xff] }
  0x25   :  { %599 = vmatpush.bf16.msra.mxu1 %v1063_v26 }
  0x26   :  { %612 = vmatpush.bf16.msra.mxu2 %v1071_v27 }
  0x27   :  { %625 = vmatpush.bf16.msra.mxu3 %v1079_v28 }
  0x28   :  { %587 = vmatpush.bf16.msra.mxu0 %v1054_v29 }
  0x29   :  { %600 = vmatpush.bf16.msra.mxu1 %v1062_v30 }
  0x2a   :  { %613 = vmatpush.bf16.msra.mxu2 %v1070_v31 }
  0x2b   :  { %626 = vmatpush.bf16.msra.mxu3 %v1078_v32  ;;  %588 = vmatmul.bf16.vlgmr.msra.gmra.mxu0 %v180_v39 }
  0x2c   :  { %632 = vmatpush.bf16.msrb.mxu0 %v1093_v33  ;;  %601 = vmatmul.bf16.vlgmr.msra.gmra.mxu1 %v181_v42 }
  0x2d   :  { %645 = vmatpush.bf16.msrb.mxu1 %v1101_v34  ;;  %614 = vmatmul.bf16.vlgmr.msra.gmra.mxu2 %v182_v38 }
  0x2e   :  { %658 = vmatpush.bf16.msrb.mxu2 %v1109_v35  ;;  %627 = vmatmul.bf16.vlgmr.msra.gmra.mxu3 %v183_v41  ;;  %v688_v35 = vlaneseq }
  0x2f   :  { %671 = vmatpush.bf16.msrb.mxu3 %v1117_v36 }
  0x30   :  { %633 = vmatpush.bf16.msrb.mxu0 %v1092_v37  ;;  %v689_v36 = vand.u32 127, %v688_v35 }
  0x31   :  { %646 = vmatpush.bf16.msrb.mxu1 %v1100_v40 }
  0x32   :  { %659 = vmatpush.bf16.msrb.mxu2 %v1108_v43 }
  0x33   :  { %672 = vmatpush.bf16.msrb.mxu3 %v1116_v44 }
  0x34   :  { %634 = vmatpush.bf16.msrb.mxu0 %v1091_v45 }
  0x35   :  { %647 = vmatpush.bf16.msrb.mxu1 %v1099_v46 }
  0x36   :  { %660 = vmatpush.bf16.msrb.mxu2 %v1107_v47 }
  0x37   :  { %673 = vmatpush.bf16.msrb.mxu3 %v1115_v48 }
  0x38   :  { %635 = vmatpush.bf16.msrb.mxu0 %v1090_v49 }
  0x39   :  { %648 = vmatpush.bf16.msrb.mxu1 %v1098_v50 }
  0x3a   :  { %661 = vmatpush.bf16.msrb.mxu2 %v1106_v51 }
  0x3b   :  { %674 = vmatpush.bf16.msrb.mxu3 %v1114_v52 }
  0x3c   :  { %636 = vmatpush.bf16.msrb.mxu0 %v1089_v53 }
  0x3d   :  { %649 = vmatpush.bf16.msrb.mxu1 %v1097_v54 }
  0x3e   :  { %662 = vmatpush.bf16.msrb.mxu2 %v1105_v55  ;;  %v1226_v55 = vmov 2  }
  0x3f   :  { %675 = vmatpush.bf16.msrb.mxu3 %v1113_v56  ;;  %1134 = vset.pattern.permute.xlu2 %v1226_v55  ;;  %v1227_v56 = vmov 1  }
  0x40   :  { %637 = vmatpush.bf16.msrb.mxu0 %v1088_v57  ;;  %1133 = vset.pattern.permute.xlu0 %v1227_v56  ;;  %v1228_v57 = vmov 0  }
  0x41   :  { %650 = vmatpush.bf16.msrb.mxu1 %v1096_v58  ;;  %1137 = vset.pattern.permute.xlu1 %v1228_v57 }
  0x42   :  { %663 = vmatpush.bf16.msrb.mxu2 %v1104_v59 }
  0x43   :  { %676 = vmatpush.bf16.msrb.mxu3 %v1112_v60 }
  0x44   :  { %638 = vmatpush.bf16.msrb.mxu0 %v1087_v61 }
  0x45   :  { %651 = vmatpush.bf16.msrb.mxu1 %v1095_v62 }
  0x46   :  { %664 = vmatpush.bf16.msrb.mxu2 %v1103_v63  ;;  %v1229_v63 = vmov 0.0  }
  0x47   :  { %677 = vmatpush.bf16.msrb.mxu3 %v1111_v0 }
  0x48   :  { %639 = vmatpush.bf16.msrb.mxu0 %v1086_v1 }
  0x49   :  { %652 = vmatpush.bf16.msrb.mxu1 %v1094_v2 }
  0x4a   :  { %665 = vmatpush.bf16.msrb.mxu2 %v1102_v3 }
  0x4b   :  { %678 = vmatpush.bf16.msrb.mxu3 %v1110_v4  ;;  %640 = vmatmul.bf16.vlgmr.msrb.gmra.mxu0 %v184_v5  ;;  %v1230_v4 = vmov 4   ;;  %v1231_v5 = vmov 3  }
  0x4c   :  { %653 = vmatmul.bf16.vlgmr.msrb.gmra.mxu1 %v185_v6 }
  0x4d   :  { %666 = vmatmul.bf16.vlgmr.msrb.gmra.mxu2 %v186_v7 }
  0x4e   :  { %679 = vmatmul.bf16.vlgmr.msrb.gmra.mxu3 %v187_v8 }
  0xa8   :  { %v589_v9 = vpop.f32.mrf.mxu0 }
  0xa9   :  { %v602_v10 = vpop.f32.mrf.mxu1  ;;  %v590_v18 = vadd.f32 %v1139_v15, %v589_v9 }
  0xab   :  { %v603_v19 = vadd.f32 %v602_v10, %v590_v18 }
  0xb0   :  { %v615_v11 = vpop.f32.mrf.mxu2  ;;  %v591_v13 = vpop.f32.mrf.mxu0 }
  0xb1   :  { %v628_v12 = vpop.f32.mrf.mxu3  ;;  %v604_v14 = vpop.f32.mrf.mxu1  ;;  %v616_v20 = vadd.f32 %v615_v11, %v603_v19 }
  0xb3   :  { %v629_v21 = vadd.f32 %v628_v12, %v616_v20 }
  0xb8   :  { %v617_v16 = vpop.f32.mrf.mxu2 }
  0xb9   :  { %v630_v17 = vpop.f32.mrf.mxu3 }
  0xc8   :  { %v641_v22 = vpop.f32.mrf.mxu0 }
  0xc9   :  { %v654_v23 = vpop.f32.mrf.mxu1  ;;  %v642_v24 = vadd.f32 %v641_v22, %v629_v21 }
  0xcb   :  { %v655_v25 = vadd.f32 %v654_v23, %v642_v24 }
  0xd0   :  { %v667_v26 = vpop.f32.mrf.mxu2  ;;  %v643_v29 = vpop.f32.mrf.mxu0 }
  0xd1   :  { %v680_v27 = vpop.f32.mrf.mxu3  ;;  %v668_v28 = vadd.f32 %v667_v26, %v655_v25  ;;  %v656_v30 = vpop.f32.mrf.mxu1 }
  0xd3   :  { %v1268_v31 = vadd.f32 %v680_v27, %v668_v28 }
  0xd5   :  { %v685_v32 = vsel %vm684_vm0, %v1268_v31, -inf }
  0xd6   :  { %686 = vmax.xlane.f32.xlu0 %v685_v32 }
  0xd8   :  { %v669_v33 = vpop.f32.mrf.mxu2 }
  0xd9   :  { %v682_v34 = vpop.f32.mrf.mxu3 }
  0xea   :  { %691 = vrot.lane.b32.xlu0 %v689_v36, %s1224_s22 }
 0x149   :  { %v687_v37 = vpop.xlane.xlu0 %686 }
 0x14a   :  { %v712_v38 = vsub.f32 %v1268_v31, %v687_v37  ;;  %vm690_vm1 = vcmp.ge.f32.partialorder %v1268_v31, %v687_v37 }
 0x14c   :  { %v713_v39 = vmul.f32 1.442695, %v712_v38 }
 0x14e   :  { %1140 = vpow2.f32 %v713_v39 }
 0x154   :  { %v1141_v40 = vpop.eup %1140 }
 0x155   :  { %716 = vrot.lane.b32.xlu1 %v1141_v40, %s1224_s22 }
 0x15c   :  { %v692_v41 = vpop.permute.xlu0 %691 }
 0x15d   :  { %v693_v42 = vsel %vm690_vm1, %v692_v41, 5 }
 0x15e   :  { %v694_v43 = vsel %vm684_vm0, %v693_v42, 2147483647 }
 0x15f   :  { %v696_v44 = vshra.s32 %v694_v43, 16  ;;  %v695_v48 = vand.u32 65535, %v694_v43 }
 0x161   :  { %v698_v45 = vcvt.s32.f32 %v696_v44  ;;  %v697_v50 = vcvt.s32.f32 %v695_v48 }
 0x17f   :  { %699 = vmin.xlane.f32.xlu1 %v698_v45 }
 0x1c7   :  { %v717_v46 = vpop.permute.xlu1 %716 }
 0x1c8   :  { %v720_v47 = vsel %vm719_vm2, %v717_v46, 0.0 }
 0x1c9   :  { %721 = vadd.xlane.f32.xlu2 %v720_v47 }
 0x1f2   :  { %v700_v49 = vpop.xlane.xlu1 %699 }
 0x1f3   :  { %vm701_vm3 = vcmp.eq.f32.partialorder %v698_v45, %v700_v49  ;;  %v706_v59 = vcvt.f32.s32 %v700_v49 }
 0x1f4   :  { %v702_v51 = vsel %vm701_vm3, %v697_v50, inf }
 0x1f5   :  { %703 = vmin.xlane.f32.xlu2 %v702_v51  ;;  %v707_v61 = vshll.u32 %v706_v59, 16 }
 0x23c   :  { %v722_v52 = vpop.xlane.xlu2 %721 }
 0x23d   :  { %1142 = vrcp.f32 %v722_v52 }
 0x243   :  { %v1143_v53 = vpop.eup %1142 }
 0x244   :  { %v724_v54 = vmul.f32 %v1143_v53, %v1141_v40 }
 0x246   :  { %726 = vrot.lane.b32.xlu2 %v724_v54, %s1224_s22 }
 0x268   :  { %v704_v58 = vpop.xlane.xlu2 %703 }
 0x269   :  { %v705_v60 = vcvt.f32.s32 %v704_v58 }
 0x26b   :  { %v708_v62 = vadd.s32 %v707_v61, %v705_v60 }
 0x26d   :  { %vm709_vm4 = vcmp.eq.s32.totalorder %v689_v36, %v708_v62 }
 0x26e   :  { %v1053_v0 = vsel %vm709_vm4, 1.0, %v1229_v63 }
 0x2a0   :  { %v727_v1 = vpop.permute.xlu2 %726 }
 0x2a1   :  { %v729_v2 = vsub.f32 %v1053_v0, %v727_v1 }
 0x2a3   :  { %v730_v3 = vadd.f32 %v729_v2, %v727_v1 }
 0x2a5   :  { %733 = vperm.xlu1 %1137, %v730_v3   ;;  %748 = vperm.xlu2 %1134, %v730_v3  }
 0x2a6   :  { %738 = vperm.xlu0 %1133, %v730_v3  }
 0x2ad   :  { %1136 = vset.pattern.permute.xlu2 %v1230_v4 }
 0x2ae   :  { %1135 = vset.pattern.permute.xlu0 %v1231_v5  ;;  %768 = vperm.xlu2 %1136, %v730_v3  }
 0x2af   :  { %758 = vperm.xlu0 %1135, %v730_v3  }
 0x2b7   :  { %1138 = vset.pattern.permute.xlu0 %v1230_v4 }
 0x2ff   :  { %v749_v6 = vpop.permute.xlu2 %748 }
 0x300   :  { %v751_v7 = vmul.f32 %v749_v6, %v1268_v31 }
 0x302   :  { %753 = vrot.lane.b32.xlu0 %v751_v7, %s1232_s2 }
 0x308   :  { %v769_v8 = vpop.permute.xlu2 %768 }
 0x309   :  { %v771_v9 = vmul.f32 %v769_v8, %v1268_v31 }
 0x30b   :  { %773 = vrot.lane.b32.xlu0 %v771_v9, %s1233_s24 }
 0x317   :  { %v734_v14 = vpop.permute.xlu1 %733 }
 0x318   :  { %v739_v10 = vpop.permute.xlu0 %738  ;;  %v736_v17 = vmul.f32 %v734_v14, %v1268_v31 }
 0x319   :  { %v741_v11 = vmul.f32 %v739_v10, %v1268_v31 }
 0x31b   :  { %743 = vrot.lane.b32.xlu2 %v741_v11, %s1234_s25 }
 0x321   :  { %v759_v12 = vpop.permute.xlu0 %758 }
 0x322   :  { %v761_v13 = vmul.f32 %v759_v12, %v1268_v31 }
 0x324   :  { %763 = vrot.lane.b32.xlu2 %v761_v13, %s1235_s26 }
 0x374   :  { %v754_v16 = vpop.permute.xlu0 %753 }
 0x375   :  { %v744_v15 = vpop.permute.xlu2 %743 }
 0x376   :  { %v746_v18 = vadd.f32 %v744_v15, %v736_v17 }
 0x378   :  { %v756_v19 = vadd.f32 %v754_v16, %v746_v18 }
 0x37d   :  { %v774_v22 = vpop.permute.xlu0 %773 }
 0x37e   :  { %v764_v20 = vpop.permute.xlu2 %763 }
 0x37f   :  { %v766_v21 = vadd.f32 %v764_v20, %v756_v19 }
 0x381   :  { %v776_v23 = vadd.f32 %v774_v22, %v766_v21 }
 0x383   :  { %778 = vst.msk [vmem:[#allocation7] sm:$0x3] %vm777_vm5, %v776_v23 }
 0x384   :  { %789 = dma.vmem_to_hbm [thread:$0]  %s785_s28, 32, %s787_s4, [#allocation4]  }
 0x385   :  { %1220 = dma.done.wait [#allocation4], 32  }
 0x386   :  { %1221 = vsyncadd [#allocation4], 4294967264 }
 0x387   :  { %794 = vsyncpa [#allocation3], 1 }
 0x388   :  { %795 = vsyncpa [#allocation6], 1 }
 0x389   :  { %796 = vsyncpa [#allocation4], 1 }

</bundles_post_ra>
